<compile_context>
chip_gen: v7x
topology: tpu7x:2x2x1
jax: 0.10.0
libtpu: 0.0.40
codegen_flags: <defaults>
</compile_context>

<pallas_src>
import functools
import numpy as np
import jax
import jax.numpy as jnp
from jax import lax
from jax.experimental import pallas as pl
from jax.experimental.pallas import tpu as pltpu

LN_EPS = 1e-12


def _round_up(x, m):
    return (x + m - 1) // m * m


def _pad_2d(x, rows, cols):
    r, c = x.shape
    return jnp.pad(x, ((0, rows - r), (0, cols - c)))


def _blk_bytes(shape, dtype):
    """VMEM footprint of one buffered block ((8,128)-padded)."""
    r, c = shape[-2], shape[-1]
    return _round_up(r, 8) * _round_up(c, 128) * jnp.dtype(dtype).itemsize


def _vmem_limit(blocks):
    """Declared VMEM limit: double-buffered footprint + headroom, clamped to 64 MiB."""
    tot = sum(2 * _blk_bytes(s, d) for s, d in blocks)
    return int(np.clip(tot + max(tot // 2, 4 << 20), 16 << 20, 64 << 20))


def _ln_padded(x, gamma, beta, h_real):
    """LayerNorm over the true H with zero lane-padding.

    x, gamma, beta are zero in the padded columns.  Centered two-pass variance
    (exact, no E[x^2]-u^2 cancellation); the padded lanes are masked out of the
    centered residual so they never pollute the variance.
    """
    hp = x.shape[-1]
    inv_h = jnp.float32(1.0 / h_real)
    u = jnp.sum(x, axis=-1, keepdims=True) * inv_h
    d = x - u
    if hp != h_real:
        col = lax.broadcasted_iota(jnp.int32, (1, hp), 1)
        d = d * (col < h_real).astype(jnp.float32)
    var = jnp.sum(d * d, axis=-1, keepdims=True) * inv_h
    return d * lax.rsqrt(var + LN_EPS) * gamma + beta


def _concat_kernel(word_ref, aid_ref, pid_ref, sid_ref, gtab_ref, stab_ref,
                   g_ref, b_ref, o_ref, *, h_real, posi_off):
    """tanh(word_proj + onehot(age|posi) @ [ageW2; posiW3]) + onehot(seg) @ posi_sub, LN.

    word_proj already contains word@W1 + catmap bias (folded host-side)."""
    tm = word_ref.shape[0]
    gv = gtab_ref.shape[0]          # Ap + Pp
    sv = stab_ref.shape[0]          # Sp (seg sub-table rows)

    # age / posi one-hots live in disjoint column ranges -> add instead of concat
    iota_g = lax.broadcasted_iota(jnp.int32, (tm, gv), 1)
    oh_g = ((iota_g == aid_ref[...]).astype(jnp.bfloat16)
            + (iota_g == (pid_ref[...] + posi_off)).astype(jnp.bfloat16))
    iota_s = lax.broadcasted_iota(jnp.int32, (tm, sv), 1)
    oh_s = (iota_s == sid_ref[...]).astype(jnp.bfloat16)

    z = word_ref[...].astype(jnp.float32)
    z = z + jnp.dot(oh_g, gtab_ref[...], preferred_element_type=jnp.float32)
    seg = jnp.dot(oh_s, stab_ref[...], preferred_element_type=jnp.float32)
    emb = jnp.tanh(z) + seg
    o_ref[...] = _ln_padded(emb, g_ref[...], b_ref[...], h_real).astype(o_ref.dtype)


def _sum_kernel(word_ref, aid_ref, pid_ref, sid_ref, gtab_ref,
                g_ref, b_ref, o_ref, *, h_real, posi_off, seg_off):
    """word + (age + posi + seg) gathered in ONE stacked matmul, then LayerNorm."""
    tm = word_ref.shape[0]
    gv = gtab_ref.shape[0]          # Ap + Pp + Sp
    iota = lax.broadcasted_iota(jnp.int32, (tm, gv), 1)
    oh = ((iota == aid_ref[...]).astype(jnp.bfloat16)
          + (iota == (pid_ref[...] + posi_off)).astype(jnp.bfloat16)
          + (iota == (sid_ref[...] + seg_off)).astype(jnp.bfloat16))
    emb = (word_ref[...].astype(jnp.float32)
           + jnp.dot(oh, gtab_ref[...], preferred_element_type=jnp.float32))
    o_ref[...] = _ln_padded(emb, g_ref[...], b_ref[...], h_real).astype(o_ref.dtype)


def bert_embeddings_forward(params, word_ids, age_ids=None, seg_ids=None,
                            posi_ids=None, concat_embeddings=True,
                            out_dtype=jnp.float32):
    """JAX wrapper reproducing BertEmbeddings.forward (inference)."""
    if seg_ids is None:
        seg_ids = jnp.zeros_like(word_ids)
    if age_ids is None:
        age_ids = jnp.zeros_like(word_ids)
    if posi_ids is None:
        posi_ids = jnp.zeros_like(word_ids)

    B, S = word_ids.shape
    V, H = params["word_table"].shape
    A = params["age_table"].shape[0]
    P = params["posi_table"].shape[0]
    Sv = int(min(params["seg_table"].shape[0], P))   # seg ids index the posi table (quirk)
    N = B * S

    Hp = _round_up(H, 128)                 # lane-dense hidden (no masked vst)
    Ap = _round_up(A, 128)
    Pp = _round_up(P, 128)
    Sp = _round_up(Sv, 128)

    # ---- tile selection: TM <= 512 (v7x VMEM), >= 2 grid steps when N allows ----
    if N <= 8:
        TM = _round_up(max(N, 1), 8)
    elif N >= 1024:
        TM = 512
    else:
        TM = _round_up((N + 1) // 2, 8)
    N_pad = _round_up(N, TM)
    grid = (N_pad // TM,)

    # ---- ids: flatten, clamp (match jnp.take clamping), pad rows ----
    def flat_ids(ids, hi):
        f = jnp.clip(ids.reshape(-1).astype(jnp.int32), 0, hi - 1)
        return jnp.pad(f, (0, N_pad - N)).reshape(N_pad, 1)

    wid = flat_ids(word_ids, V).reshape(-1)     # used only for the XLA word gather
    aid = flat_ids(age_ids, A)
    pid = flat_ids(posi_ids, P)
    sid = flat_ids(seg_ids, Sv)

    gamma = _pad_2d(params["ln_gamma"].reshape(1, H), 1, Hp)
    beta = _pad_2d(params["ln_beta"].reshape(1, H), 1, Hp)

    row = lambda tm, w: pl.BlockSpec((tm, w), lambda i: (i, 0))
    full = lambda shp: pl.BlockSpec(shp, lambda i: (0, 0))

    if concat_embeddings:
        W = params["catmap_w"]                                   # (3H, H), x @ W
        b = params["catmap_b"]
        # One-time precomputes (constant-fold under jit with fixed params; hoist
        # out of the step function in production to amortize the V*H*H matmul).
        word_proj = _pad_2d(params["word_table"] @ W[:H] + b[None, :],
                            V, Hp).astype(jnp.bfloat16)          # word@W1 + bias
        age_proj = _pad_2d(params["age_table"] @ W[H:2 * H], Ap, Hp)
        posi_proj = _pad_2d(params["posi_table"] @ W[2 * H:], Pp, Hp)
        gtab = jnp.concatenate([age_proj, posi_proj], axis=0).astype(jnp.bfloat16)
        stab = _pad_2d(params["posi_table"][:Sv], Sp, Hp).astype(jnp.bfloat16)

        # XLA gather directly produces the padded bf16 pre-projected stream.
        word_e = jnp.take(word_proj, wid, axis=0)                # (N_pad, Hp) bf16

        vmem = _vmem_limit([
            ((TM, Hp), jnp.bfloat16),
            ((TM, 1), jnp.int32), ((TM, 1), jnp.int32), ((TM, 1), jnp.int32),
            ((Ap + Pp, Hp), jnp.bfloat16), ((Sp, Hp), jnp.bfloat16),
            ((1, Hp), jnp.float32), ((1, Hp), jnp.float32),
            ((TM, Hp), out_dtype),
        ])
        cparams = pltpu.CompilerParams(
            dimension_semantics=("parallel",), vmem_limit_bytes=vmem)

        out = pl.pallas_call(
            functools.partial(_concat_kernel, h_real=H, posi_off=Ap),
            out_shape=jax.ShapeDtypeStruct((N_pad, Hp), out_dtype),
            grid=grid,
            in_specs=[
                row(TM, Hp),            # pre-projected word stream (bf16)
                row(TM, 1),             # age ids
                row(TM, 1),             # posi ids
                row(TM, 1),             # seg ids
                full((Ap + Pp, Hp)),    # stacked [age@W2 ; posi@W3]
                full((Sp, Hp)),         # posi-table rows used by seg (quirk)
                full((1, Hp)),          # LN gamma
                full((1, Hp)),          # LN beta
            ],
            out_specs=row(TM, Hp),
            compiler_params=cparams,
        )(word_e, aid, pid, sid, gtab, stab, gamma, beta)
    else:
        # Stack age / posi / seg-subtable so all three gathers are ONE matmul.
        gtab = jnp.concatenate([
            _pad_2d(params["age_table"], Ap, Hp),
            _pad_2d(params["posi_table"], Pp, Hp),
            _pad_2d(params["posi_table"][:Sv], Sp, Hp),   # seg uses posi table (quirk)
        ], axis=0).astype(jnp.bfloat16)
        word_tab = _pad_2d(params["word_table"], V, Hp)   # keep word f32 (never hits MXU)
        word_e = jnp.take(word_tab, wid, axis=0)          # (N_pad, Hp) f32

        vmem = _vmem_limit([
            ((TM, Hp), jnp.float32),
            ((TM, 1), jnp.int32), ((TM, 1), jnp.int32), ((TM, 1), jnp.int32),
            ((Ap + Pp + Sp, Hp), jnp.bfloat16),
            ((1, Hp), jnp.float32), ((1, Hp), jnp.float32),
            ((TM, Hp), out_dtype),
        ])
        cparams = pltpu.CompilerParams(
            dimension_semantics=("parallel",), vmem_limit_bytes=vmem)

        out = pl.pallas_call(
            functools.partial(_sum_kernel, h_real=H, posi_off=Ap, seg_off=Ap + Pp),
            out_shape=jax.ShapeDtypeStruct((N_pad, Hp), out_dtype),
            grid=grid,
            in_specs=[
                row(TM, Hp),
                row(TM, 1), row(TM, 1), row(TM, 1),
                full((Ap + Pp + Sp, Hp)),
                full((1, Hp)), full((1, Hp)),
            ],
            out_specs=row(TM, Hp),
            compiler_params=cparams,
        )(word_e, aid, pid, sid, gtab, gamma, beta)

    return out[:N, :H].reshape(B, S, H)


def _init_posi_embedding(max_position_embedding, hidden_size):
    """Exact replica of BertEmbeddings._init_posi_embedding (sin/cos table)."""
    pos = np.arange(max_position_embedding, dtype=np.float32)[:, None]
    idx = np.arange(hidden_size, dtype=np.float32)[None, :]
    angle = pos / np.power(10000.0, 2.0 * idx / hidden_size)
    table = np.where((np.arange(hidden_size) % 2 == 0)[None, :],
                     np.sin(angle), np.cos(angle)).astype(np.float32)
    return jnp.asarray(table)


def make_params(key, vocab_size, seg_vocab_size, age_vocab_size,
                max_position_embeddings, hidden_size):
    ks = jax.random.split(key, 6)
    H = hidden_size
    params = {
        "word_table": 0.02 * jax.random.normal(ks[0], (vocab_size, H), jnp.float32),
        "seg_table": 0.02 * jax.random.normal(ks[1], (seg_vocab_size, H), jnp.float32),
        "age_table": 0.02 * jax.random.normal(ks[2], (age_vocab_size, H), jnp.float32),
        "posi_table": _init_posi_embedding(max_position_embeddings, H),
        "ln_gamma": jnp.ones((H,), jnp.float32),
        "ln_beta": jnp.zeros((H,), jnp.float32),
        # nn.Linear(3H, H): stored transposed so forward does x @ W (W: 3H x H)
        "catmap_w": (1.0 / np.sqrt(3 * H)) *
                    jax.random.normal(ks[3], (3 * H, H), jnp.float32),
        "catmap_b": (1.0 / np.sqrt(3 * H)) *
                    jax.random.normal(ks[4], (H,), jnp.float32),
    }
    return params


def _reference(params, word_ids, age_ids, seg_ids, posi_ids, concat):
    """Pure f32 reference of the PyTorch forward."""
    w = jnp.take(params["word_table"], word_ids, axis=0)
    a = jnp.take(params["age_table"], age_ids, axis=0)
    p = jnp.take(params["posi_table"], posi_ids, axis=0)
    s = jnp.take(params["posi_table"], seg_ids, axis=0)   # posi-table quirk
    if concat:
        cat = jnp.concatenate([w, a, p], axis=-1)
        emb = jnp.tanh(cat @ params["catmap_w"] + params["catmap_b"]) + s
    else:
        emb = w + s + a + p
    u = jnp.mean(emb, -1, keepdims=True)
    v = jnp.mean((emb - u) ** 2, -1, keepdims=True)
    return ((emb - u) / jnp.sqrt(v + LN_EPS)) * params["ln_gamma"] + params["ln_beta"]


if __name__ == "__main__":
    # small config: batch=2, seq=8, hidden=32
    B, S, H = 2, 8, 32
    vocab_size, seg_vocab_size, age_vocab_size, max_pos = 50, 2, 20, 64

    key = jax.random.PRNGKey(0)
    kp, k1, k2, k3 = jax.random.split(key, 4)
    params = make_params(kp, vocab_size, seg_vocab_size, age_vocab_size, max_pos, H)

    word_ids = jax.random.randint(k1, (B, S), 0, vocab_size, dtype=jnp.int32)
    age_ids = jax.random.randint(k2, (B, S), 0, age_vocab_size, dtype=jnp.int32)
    seg_ids = jax.random.randint(k3, (B, S), 0, seg_vocab_size, dtype=jnp.int32)
    posi_ids = jnp.tile(jnp.arange(S, dtype=jnp.int32)[None, :], (B, 1))

    fwd = jax.jit(functools.partial(bert_embeddings_forward,
                                    concat_embeddings=True))
    out = fwd(params, word_ids, age_ids, seg_ids, posi_ids)
    out = jax.block_until_ready(out)

    ref = _reference(params, word_ids, age_ids, seg_ids, posi_ids, concat=True)
    assert out.shape == (B, S, H)
    # bf16 gather tables / pre-projected stream on the MXU (f32 accumulation)
    np.testing.assert_allclose(np.asarray(out), np.asarray(ref),
                               rtol=5e-2, atol=5e-2)

    # also exercise the non-concat branch once
    out2 = jax.block_until_ready(
        bert_embeddings_forward(params, word_ids, age_ids, seg_ids, posi_ids,
                                concat_embeddings=False))
    ref2 = _reference(params, word_ids, age_ids, seg_ids, posi_ids, concat=False)
    np.testing.assert_allclose(np.asarray(out2), np.asarray(ref2),
                               rtol=5e-2, atol=5e-2)

    print("KERNEL_OK")
</pallas_src>

<mosaic_0001>
module attributes {stable_mosaic.version = 11 : i64} {
  func.func @_concat_kernel(%arg0: i32, %arg1: memref<8x128xbf16, #tpu.memory_space<vmem>>, %arg2: memref<8x1xi32, #tpu.memory_space<vmem>>, %arg3: memref<8x1xi32, #tpu.memory_space<vmem>>, %arg4: memref<8x1xi32, #tpu.memory_space<vmem>>, %arg5: memref<256x128xbf16, #tpu.memory_space<vmem>>, %arg6: memref<128x128xbf16, #tpu.memory_space<vmem>>, %arg7: memref<1x128xf32, #tpu.memory_space<vmem>>, %arg8: memref<1x128xf32, #tpu.memory_space<vmem>>, %arg9: memref<8x128xf32, #tpu.memory_space<vmem>>) attributes {dimension_semantics = [#tpu.dimension_semantics<parallel>], iteration_bounds = array<i64: 2>, scalar_prefetch = 0 : i64, scratch_operands = 0 : i64, tpu.core_type = #tpu.core_type<tc>, window_params = [{transform_indices = @transform_0, window_bounds = array<i64: 8, 128>}, {transform_indices = @transform_1, window_bounds = array<i64: 8, 1>}, {transform_indices = @transform_2, window_bounds = array<i64: 8, 1>}, {transform_indices = @transform_3, window_bounds = array<i64: 8, 1>}, {pipeline_mode = #tpu.pipeline_mode<synchronous>, transform_indices = @transform_4, window_bounds = array<i64: 256, 128>}, {pipeline_mode = #tpu.pipeline_mode<synchronous>, transform_indices = @transform_5, window_bounds = array<i64: 128, 128>}, {pipeline_mode = #tpu.pipeline_mode<synchronous>, transform_indices = @transform_6, window_bounds = array<i64: 1, 128>}, {pipeline_mode = #tpu.pipeline_mode<synchronous>, transform_indices = @transform_7, window_bounds = array<i64: 1, 128>}, {transform_indices = @transform_8, window_bounds = array<i64: 8, 128>}]} {
    %0 = tpu.iota {dimensions = array<i32: 1>} : vector<8x256xi32>
    %c0 = arith.constant 0 : index
    %c0_0 = arith.constant 0 : index
    %1 = vector.load %arg2[%c0, %c0_0] : memref<8x1xi32, #tpu.memory_space<vmem>>, vector<8x1xi32>
    %2 = vector.broadcast %1 : vector<8x1xi32> to vector<8x256xi32>
    %3 = arith.cmpi eq, %0, %2 : vector<8x256xi32>
    %4 = arith.extui %3 : vector<8x256xi1> to vector<8x256xi32>
    %5 = arith.sitofp %4 : vector<8x256xi32> to vector<8x256xf32>
    %6 = arith.truncf %5 : vector<8x256xf32> to vector<8x256xbf16>
    %c0_1 = arith.constant 0 : index
    %c0_2 = arith.constant 0 : index
    %7 = vector.load %arg3[%c0_1, %c0_2] : memref<8x1xi32, #tpu.memory_space<vmem>>, vector<8x1xi32>
    %c128_i32 = arith.constant 128 : i32
    %8 = vector.broadcast %c128_i32 : i32 to vector<8x1xi32>
    %9 = arith.addi %7, %8 : vector<8x1xi32>
    %10 = vector.broadcast %9 : vector<8x1xi32> to vector<8x256xi32>
    %11 = arith.cmpi eq, %0, %10 : vector<8x256xi32>
    %12 = arith.extui %11 : vector<8x256xi1> to vector<8x256xi32>
    %13 = arith.sitofp %12 : vector<8x256xi32> to vector<8x256xf32>
    %14 = arith.truncf %13 : vector<8x256xf32> to vector<8x256xbf16>
    %15 = arith.addf %6, %14 : vector<8x256xbf16>
    %16 = tpu.iota {dimensions = array<i32: 1>} : vector<8x128xi32>
    %c0_3 = arith.constant 0 : index
    %c0_4 = arith.constant 0 : index
    %17 = vector.load %arg4[%c0_3, %c0_4] : memref<8x1xi32, #tpu.memory_space<vmem>>, vector<8x1xi32>
    %18 = vector.broadcast %17 : vector<8x1xi32> to vector<8x128xi32>
    %19 = arith.cmpi eq, %16, %18 : vector<8x128xi32>
    %20 = arith.extui %19 : vector<8x128xi1> to vector<8x128xi32>
    %21 = arith.sitofp %20 : vector<8x128xi32> to vector<8x128xf32>
    %22 = arith.truncf %21 : vector<8x128xf32> to vector<8x128xbf16>
    %c0_5 = arith.constant 0 : index
    %c0_6 = arith.constant 0 : index
    %23 = vector.load %arg1[%c0_5, %c0_6] : memref<8x128xbf16, #tpu.memory_space<vmem>>, vector<8x128xbf16>
    %24 = arith.extf %23 : vector<8x128xbf16> to vector<8x128xf32>
    %c0_7 = arith.constant 0 : index
    %c0_8 = arith.constant 0 : index
    %25 = vector.load %arg5[%c0_7, %c0_8] : memref<256x128xbf16, #tpu.memory_space<vmem>>, vector<256x128xbf16>
    %cst = arith.constant dense<0.000000e+00> : vector<8x128xf32>
    %26 = tpu.matmul %15, %25, %cst {dimension_numbers = #tpu.dot_dimension_numbers<[1], [0], [0], [1], [0, 0, 1, 1], [], []>} : vector<8x256xbf16>, vector<256x128xbf16>, vector<8x128xf32> -> vector<8x128xf32>
    %27 = arith.addf %24, %26 : vector<8x128xf32>
    %c0_9 = arith.constant 0 : index
    %c0_10 = arith.constant 0 : index
    %28 = vector.load %arg6[%c0_9, %c0_10] : memref<128x128xbf16, #tpu.memory_space<vmem>>, vector<128x128xbf16>
    %cst_11 = arith.constant dense<0.000000e+00> : vector<8x128xf32>
    %29 = tpu.matmul %22, %28, %cst_11 {dimension_numbers = #tpu.dot_dimension_numbers<[1], [0], [0], [1], [0, 0, 1, 1], [], []>} : vector<8x128xbf16>, vector<128x128xbf16>, vector<8x128xf32> -> vector<8x128xf32>
    %30 = math.tanh %27 : vector<8x128xf32>
    %31 = arith.addf %30, %29 : vector<8x128xf32>
    %c0_12 = arith.constant 0 : index
    %c0_13 = arith.constant 0 : index
    %32 = vector.load %arg7[%c0_12, %c0_13] : memref<1x128xf32, #tpu.memory_space<vmem>>, vector<1x128xf32>
    %c0_14 = arith.constant 0 : index
    %c0_15 = arith.constant 0 : index
    %33 = vector.load %arg8[%c0_14, %c0_15] : memref<1x128xf32, #tpu.memory_space<vmem>>, vector<1x128xf32>
    %cst_16 = arith.constant dense<0.000000e+00> : vector<8xf32>
    %34 = vector.multi_reduction <add>, %31, %cst_16 [1] : vector<8x128xf32> to vector<8xf32>
    %35 = vector.shape_cast %34 : vector<8xf32> to vector<8x1xf32>
    %cst_17 = arith.constant 3.125000e-02 : f32
    %36 = vector.broadcast %cst_17 : f32 to vector<8x1xf32>
    %37 = arith.mulf %35, %36 : vector<8x1xf32>
    %38 = vector.broadcast %37 : vector<8x1xf32> to vector<8x128xf32>
    %39 = arith.subf %31, %38 : vector<8x128xf32>
    %40 = tpu.iota {dimensions = array<i32: 1>} : vector<1x128xi32>
    %c32_i32 = arith.constant 32 : i32
    %41 = vector.broadcast %c32_i32 : i32 to vector<1x128xi32>
    %42 = arith.cmpi slt, %40, %41 : vector<1x128xi32>
    %43 = arith.extui %42 : vector<1x128xi1> to vector<1x128xi32>
    %44 = arith.sitofp %43 : vector<1x128xi32> to vector<1x128xf32>
    %45 = vector.broadcast %44 : vector<1x128xf32> to vector<8x128xf32>
    %46 = arith.mulf %39, %45 : vector<8x128xf32>
    %47 = arith.mulf %46, %46 : vector<8x128xf32>
    %cst_18 = arith.constant dense<0.000000e+00> : vector<8xf32>
    %48 = vector.multi_reduction <add>, %47, %cst_18 [1] : vector<8x128xf32> to vector<8xf32>
    %49 = vector.shape_cast %48 : vector<8xf32> to vector<8x1xf32>
    %cst_19 = arith.constant 3.125000e-02 : f32
    %50 = vector.broadcast %cst_19 : f32 to vector<8x1xf32>
    %51 = arith.mulf %49, %50 : vector<8x1xf32>
    %cst_20 = arith.constant 9.99999996E-13 : f32
    %52 = vector.broadcast %cst_20 : f32 to vector<8x1xf32>
    %53 = arith.addf %51, %52 : vector<8x1xf32>
    %54 = math.rsqrt %53 : vector<8x1xf32>
    %55 = vector.broadcast %54 : vector<8x1xf32> to vector<8x128xf32>
    %56 = arith.mulf %46, %55 : vector<8x128xf32>
    %57 = vector.broadcast %32 : vector<1x128xf32> to vector<8x128xf32>
    %58 = arith.mulf %56, %57 : vector<8x128xf32>
    %59 = vector.broadcast %33 : vector<1x128xf32> to vector<8x128xf32>
    %60 = arith.addf %58, %59 : vector<8x128xf32>
    %c0_21 = arith.constant 0 : index
    %c0_22 = arith.constant 0 : index
    %61 = vector.load %arg9[%c0_21, %c0_22] : memref<8x128xf32, #tpu.memory_space<vmem>>, vector<8x128xf32>
    tpu.vector_store %arg9[%c0_21, %c0_22], %60 {strides = array<i32>} : memref<8x128xf32, #tpu.memory_space<vmem>>, vector<8x128xf32>,
    return
  }
  func.func @transform_0(%arg0: i32) -> (i32, i32) {
    %c0_i32 = arith.constant 0 : i32
    %c0_i32_0 = arith.constant 0 : i32
    return %arg0, %c0_i32 : i32, i32
  }
  func.func @transform_1(%arg0: i32) -> (i32, i32) {
    %c0_i32 = arith.constant 0 : i32
    %c0_i32_0 = arith.constant 0 : i32
    return %arg0, %c0_i32 : i32, i32
  }
  func.func @transform_2(%arg0: i32) -> (i32, i32) {
    %c0_i32 = arith.constant 0 : i32
    %c0_i32_0 = arith.constant 0 : i32
    return %arg0, %c0_i32 : i32, i32
  }
  func.func @transform_3(%arg0: i32) -> (i32, i32) {
    %c0_i32 = arith.constant 0 : i32
    %c0_i32_0 = arith.constant 0 : i32
    return %arg0, %c0_i32 : i32, i32
  }
  func.func @transform_4(%arg0: i32) -> (i32, i32) {
    %c0_i32 = arith.constant 0 : i32
    %c0_i32_0 = arith.constant 0 : i32
    %c0_i32_1 = arith.constant 0 : i32
    return %c0_i32, %c0_i32_0 : i32, i32
  }
  func.func @transform_5(%arg0: i32) -> (i32, i32) {
    %c0_i32 = arith.constant 0 : i32
    %c0_i32_0 = arith.constant 0 : i32
    %c0_i32_1 = arith.constant 0 : i32
    return %c0_i32, %c0_i32_0 : i32, i32
  }
  func.func @transform_6(%arg0: i32) -> (i32, i32) {
    %c0_i32 = arith.constant 0 : i32
    %c0_i32_0 = arith.constant 0 : i32
    %c0_i32_1 = arith.constant 0 : i32
    return %c0_i32, %c0_i32_0 : i32, i32
  }
  func.func @transform_7(%arg0: i32) -> (i32, i32) {
    %c0_i32 = arith.constant 0 : i32
    %c0_i32_0 = arith.constant 0 : i32
    %c0_i32_1 = arith.constant 0 : i32
    return %c0_i32, %c0_i32_0 : i32, i32
  }
  func.func @transform_8(%arg0: i32) -> (i32, i32) {
    %c0_i32 = arith.constant 0 : i32
    %c0_i32_0 = arith.constant 0 : i32
    return %arg0, %c0_i32 : i32, i32
  }
}

</mosaic_0001>

<bundles_post_ra>
// kernel: bert_embeddings_forward.1
= control target key start
LH: loop header
LB: loop body
LE: loop exit
PB: predicated region body
PF: predicated region fallthrough
CT: control target
= control target key end

     0   :  { %s985_s27 = smov 0   ;;  %s1113_s0 = inlined_call_operand.vmem [shape: bf16[16,128], index: 0, kind: input, shape index: {}]   ;;  %s1114_s1 = inlined_call_operand.vmem [shape: s32[16,1], index: 1, kind: input, shape index: {}]   ;;  %s1115_s2 = inlined_call_operand.vmem [shape: s32[16,1], index: 2, kind: input, shape index: {}]   ;;  %s1116_s3 = inlined_call_operand.vmem [shape: s32[16,1], index: 3, kind: input, shape index: {}]   ;;  %s1117_s4 = inlined_call_operand.vmem [shape: bf16[256,128], index: 4, kind: input, shape index: {}]   ;;  %s1118_s5 = inlined_call_operand.vmem [shape: bf16[128,128], index: 5, kind: input, shape index: {}]   ;;  %s1119_s6 = inlined_call_operand.vmem [shape: f32[1,128], index: 6, kind: input, shape index: {}]   ;;  %s1120_s7 = inlined_call_operand.vmem [shape: f32[1,128], index: 7, kind: input, shape index: {}]   ;;  %s1121_s8 = inlined_call_operand.vmem [shape: f32[16,128], index: 8, kind: output, shape index: {}]  }
   0x1 LB: > { %s789_s28 = sadd.s32 4294967295, %s934_s27   ;;  %p793_p0 = scmp.ge.s32.totalorder %s934_s27, 1  ;;  %s934_s27 = sphi %s985_s27, %s18_s27  }
   0x2   : > { %p288_p1 = scmp.lt.s32.totalorder %s934_s27, 3 }
   0x4   : > { %p289_p2 = pnand %p793_p0, %p288_p1 }
   0x5   : > { %p332_p3 = scmp.lt.s32.totalorder (!%p289_p2), %s789_s28, 1  ;;  %v936_v0 = vmov (!%p289_p2), 0   ;;  %v900_v1 = vld [vmem:[%s1117_s4 + $0x40] sm:$0xff] (!%p289_p2)   ;;  %v937_v3 = vmov (!%p289_p2), 0.0   ;;  %v902_v4 = vld [vmem:[%s1117_s4 + $0x48] sm:$0xff] (!%p289_p2)   ;;  %v904_v6 = vld [vmem:[%s1117_s4 + $0x50] sm:$0xff] (!%p289_p2)   ;;  %v353_v30 = vlaneseq (!%p289_p2) }
   0x6   : > { %292 = sbr.rel (%p289_p2) target bundleno = 700 (0x2bc), region = 52  ;;  %898 = vset.pattern.permute.xlu0 (!%p289_p2), %v936_v0  ;;  %899 = vset.pattern.permute.xlu1 (!%p289_p2), %v936_v0  ;;  %v901_v2 = vld [vmem:[%s1117_s4] sm:$0xff] (!%p289_p2)   ;;  %v903_v5 = vld [vmem:[%s1117_s4 + $0x8] sm:$0xff] (!%p289_p2)   ;;  %v905_v11 = vld [vmem:[%s1117_s4 + $0x10] sm:$0xff] (!%p289_p2)   ;;  %vm938_vm0 = vmmov (!%p289_p2), 0  }
   0x7   : > { %866 = vmatprep.subr.bf16.mxu1 (!%p289_p2), %v937_v3  ;;  %835 = vmatprep.subr.bf16.mxu0 (!%p289_p2), %v900_v1  ;;  %v906_v12 = vld [vmem:[%s1117_s4 + $0x58] sm:$0xff] (!%p289_p2)   ;;  %v908_v13 = vld [vmem:[%s1118_s5] sm:$0xff] (!%p289_p2)   ;;  %v911_v16 = vld [vmem:[%s1118_s5 + $0x8] sm:$0xff] (!%p289_p2)   ;;  %v354_v31 = vand.u32 (!%p289_p2), 127, %v353_v30  ;;  %v939_v38 = vmov (!%p289_p2), 1.0|1.0  }
   0x8   : > { %836 = vmatpush3.bf16.msra.mxu0 (!%p289_p2), %v901_v2  ;;  %v907_v14 = vld [vmem:[%s1117_s4 + $0x18] sm:$0xff] (!%p289_p2)   ;;  %867 = vmatpush3.bf16.msra.mxu1 (!%p289_p2), %v908_v13  ;;  %v909_v15 = vld [vmem:[%s1117_s4 + $0x60] sm:$0xff] (!%p289_p2)   ;;  %v914_v18 = vld [vmem:[%s1118_s5 + $0x10] sm:$0xff] (!%p289_p2)  }
   0x9   : > { %837 = vmatprep.subr.bf16.mxu0 (!%p289_p2), %v902_v4  ;;  %868 = vmatprep.subr.bf16.mxu1 (!%p289_p2), %v937_v3  ;;  %v910_v17 = vld [vmem:[%s1117_s4 + $0x20] sm:$0xff] (!%p289_p2)   ;;  %v912_v19 = vld [vmem:[%s1117_s4 + $0x68] sm:$0xff] (!%p289_p2)   ;;  %v917_v21 = vld [vmem:[%s1118_s5 + $0x18] sm:$0xff] (!%p289_p2)   ;;  %v355_v32 = vadd.s32 (!%p289_p2), 128, %v354_v31  ;;  %vm674_vm7 = vcmp.lt.s32.totalorder (!%p289_p2), %v354_v31, 32 }
   0xa   : > { %v913_v20 = vld [vmem:[%s1117_s4 + $0x28] sm:$0xff] (!%p289_p2)   ;;  %882 = vmatprep.mubr.msk.bf16.mxu1 (!%p289_p2), %vm938_vm0, %v937_v3  ;;  %v915_v22 = vld [vmem:[%s1117_s4 + $0x70] sm:$0xff] (!%p289_p2)   ;;  %v920_v24 = vld [vmem:[%s1118_s5 + $0x20] sm:$0xff] (!%p289_p2)   ;;  %v830_v63 = vsel (!%p289_p2), %vm674_vm7, 1.0, %v937_v3 }
   0xb   : > { %v916_v23 = vld [vmem:[%s1117_s4 + $0x30] sm:$0xff] (!%p289_p2)   ;;  %v918_v25 = vld [vmem:[%s1117_s4 + $0x78] sm:$0xff] (!%p289_p2)   ;;  %v921_v27 = vld [vmem:[%s1118_s5 + $0x28] sm:$0xff] (!%p289_p2)  }
   0xc   : > { %838 = vmatpush3.bf16.msra.mxu0 (!%p289_p2), %v903_v5  ;;  %869 = vmatpush3.bf16.msra.mxu1 (!%p289_p2), %v911_v16  ;;  %v919_v26 = vld [vmem:[%s1117_s4 + $0x38] sm:$0xff] (!%p289_p2)   ;;  %v922_v28 = vld [vmem:[%s1118_s5 + $0x30] sm:$0xff] (!%p289_p2)  }
   0xd   : > { %s1123_s28 = smov (!%p332_p3, %s789_s28), 1  ;;  %839 = vmatprep.subr.bf16.mxu0 %v904_v6  ;;  %870 = vmatprep.subr.bf16.mxu1 %v937_v3  ;;  %v923_v29 = vld [vmem:[%s1118_s5 + $0x38] sm:$0xff]  }
   0xe   : > { %s1006_s13 = sshll.u32 %s1123_s28, 3  ;;  %s794_s29 = sshll.u32 %s1123_s28, 2 }
   0xf   : > { %s339_s18 = scalar_lea.vmem %s1114_s1, %s1006_s13  ;;  %s343_s23 = scalar_lea.vmem %s1115_s2, %s1006_s13 }
  0x10   : > { %v356_v7 = vld [vmem:[%s339_s18] sm:$0xff]  ;;  %s347_s26 = scalar_lea.vmem %s1116_s3, %s1006_s13  ;;  %840 = vmatpush3.bf16.msra.mxu0 %v905_v11  ;;  %871 = vmatpush3.bf16.msra.mxu1 %v914_v18  ;;  %s335_s10 = scalar_lea.vmem %s1113_s0, %s794_s29 }
  0x11   : > { %358 = vperm.xlu0 %898, %v356_v7   ;;  %v368_v8 = vld [vmem:[%s343_s23] sm:$0xff]  ;;  %841 = vmatprep.subr.bf16.mxu0 %v906_v12  ;;  %s351_s17 = scalar_lea.vmem %s1121_s8, %s1006_s13 }
  0x12   : > { %v383_v9 = vld [vmem:[%s347_s26] sm:$0xff]  ;;  %v369_v10 = vadd.s32 128, %v368_v8  ;;  %872 = vmatprep.subr.bf16.mxu1 %v937_v3 }
  0x13   : > { %385 = vperm.xlu1 %899, %v383_v9   ;;  %v391_v51 = vld [vmem:[%s335_s10] sm:$0xf] }
  0x14   : > { %842 = vmatpush3.bf16.msra.mxu0 %v907_v14  ;;  %873 = vmatpush3.bf16.msra.mxu1 %v917_v21  ;;  %v392_v53 = vunpack.c.l.bf16 %v391_v51  ;;  %v831_v8 = vld [vmem:[%s1119_s6] ss:$0 sm:$0xff] }
  0x15   : > { %371 = vperm.xlu0 %898, %v369_v10   ;;  %843 = vmatprep.subr.bf16.mxu0 %v909_v15  ;;  %v832_v10 = vld [vmem:[%s1120_s7] ss:$0 sm:$0xff] }
  0x16   : > { %874 = vmatprep.subr.bf16.mxu1 %v937_v3 }
  0x18   : > { %844 = vmatpush3.bf16.msra.mxu0 %v910_v17  ;;  %875 = vmatpush3.bf16.msra.mxu1 %v920_v24 }
  0x19   : > { %845 = vmatprep.subr.bf16.mxu0 %v912_v19  ;;  %876 = vmatprep.subr.bf16.mxu1 %v937_v3 }
  0x1c   : > { %846 = vmatpush3.bf16.msra.mxu0 %v913_v20  ;;  %877 = vmatpush3.bf16.msra.mxu1 %v921_v27 }
  0x1d   : > { %847 = vmatprep.subr.bf16.mxu0 %v915_v22  ;;  %878 = vmatprep.subr.bf16.mxu1 %v937_v3 }
  0x20   : > { %848 = vmatpush3.bf16.msra.mxu0 %v916_v23  ;;  %879 = vmatpush3.bf16.msra.mxu1 %v922_v28 }
  0x21   : > { %849 = vmatprep.subr.bf16.mxu0 %v918_v25  ;;  %880 = vmatprep.subr.bf16.mxu1 %v937_v3 }
  0x24   : > { %850 = vmatpush3.bf16.msra.mxu0 %v919_v26  ;;  %881 = vmatpush3.bf16.msra.mxu1 %v923_v29 }
  0x90   : > { %v359_v33 = vpop.permute.xlu0 %358 }
  0x91   : > { %vm360_vm1 = vcmp.eq.s32.totalorder %v354_v31, %v359_v33  ;;  %vm361_vm2 = vcmp.eq.s32.totalorder %v355_v32, %v359_v33 }
  0x92   : > { %v386_v34 = vpop.permute.xlu1 %385  ;;  %v799_v35 = vsel %vm360_vm1, 1.0, %v937_v3  ;;  %v800_v37 = vsel %vm361_vm2, 1.0, %v937_v3 }
  0x93   : > { %vm387_vm3 = vcmp.eq.s32.totalorder %v354_v31, %v386_v34  ;;  %v366_v41 = vpack.c.bf16 %v799_v35, %v799_v35  ;;  %v367_v43 = vpack.c.bf16 %v800_v37, %v800_v37 }
  0x94   : > { %vm828_vm4 = vmpackc.low %vm387_vm3, %vm387_vm3  ;;  %v372_v36 = vpop.permute.xlu0 %371 }
  0x95   : > { %883 = vmatmul.mubr.msk.bf16.vlgmr.msra.gmra.mrb[0].mxu1 %vm828_vm4, %v939_v38  ;;  %vm373_vm5 = vcmp.eq.s32.totalorder %v354_v31, %v372_v36  ;;  %vm374_vm6 = vcmp.eq.s32.totalorder %v355_v32, %v372_v36 }
  0x96   : > { %v801_v39 = vsel %vm373_vm5, 1.0, %v937_v3  ;;  %v802_v40 = vsel %vm374_vm6, 1.0, %v937_v3 }
  0x97   : > { %v379_v42 = vpack.c.bf16 %v801_v39, %v801_v39  ;;  %v380_v44 = vpack.c.bf16 %v802_v40, %v802_v40 }
  0x99   : > { %v382_v45 = vadd.bf16 %v380_v44, %v367_v43  ;;  %v381_v46 = vadd.bf16 %v379_v42, %v366_v41 }
  0x9b   : > { %553 = vmatprep.mubr.bf16.mxu0 %v382_v45 }
  0x9c   : > { %554 = vmatmul.mubr.bf16.vlgmr.msra.gmra.mrb[0].mxu0 %v381_v46 }
 0x168   : > { %v660_v47 = vpop.f32.mrb[0].mxu1 }
 0x169   : > { %v884_v48 = vpop.f32.mrb[1].mxu1 }
 0x16a   : > { %v663_v49 = vpop.f32.mrb[2].mxu1 }
 0x16b   : > { %v885_v50 = vpop.f32.mrb[3].mxu1 }
 0x16f   : > { %v851_v52 = vpop.f32.mrb[0].mxu0 }
 0x170   : > { %v852_v54 = vpop.f32.mrb[1].mxu0 }
 0x171   : > { %v853_v55 = vadd.f32 %v852_v54, %v851_v52  ;;  %v854_v56 = vpop.f32.mrb[2].mxu0 }
 0x172   : > { %v855_v57 = vpop.f32.mrb[3].mxu0 }
 0x173   : > { %v561_v58 = vadd.f32 %v853_v55, %v392_v53 }
 0x175   : > { %924 = vtanh.f32 %v561_v58 }
 0x17f   : > { %v925_v59 = vpop.eup %924 }
 0x180   : > { %v667_v60 = vadd.f32 %v925_v59, %v660_v47 }
 0x182   : > { %670 = vadd.xlane.f32.xlu1 %v667_v60 }
 0x20f   : > { %v671_v61 = vpop.xlane.xlu1 %670 }
 0x210   : > { %v672_v62 = vmul.f32 0.03125, %v671_v61 }
 0x212   : > { %v673_v0 = vsub.f32 %v667_v60, %v672_v62 }
 0x214   : > { %v677_v1 = vmul.f32 %v830_v63, %v673_v0 }
 0x216   : > { %v678_v2 = vmul.f32 %v677_v1, %v677_v1 }
 0x218   : > { %679 = vadd.xlane.f32.xlu0 %v678_v2 }
 0x2a5   : > { %v680_v4 = vpop.xlane.xlu0 %679 }
 0x2a6   : > { %v681_v5 = vmul.f32 0.03125, %v680_v4 }
 0x2a8   : > { %v682_v6 = vadd.f32 1e-12, %v681_v5 }
 0x2aa   : > { %926 = vrsqrt.f32 %v682_v6 }
 0x2b4   : > { %v927_v7 = vpop.eup %926 }
 0x2b5   : > { %v684_v9 = vmul.f32 %v927_v7, %v677_v1 }
 0x2b7   : > { %v691_v11 = vmul.f32 %v831_v8, %v684_v9 }
 0x2b9   : > { %v698_v3 = vadd.f32 %v832_v10, %v691_v11 }
 0x2bb   : > { %699 = vst [vmem:[%s351_s17] sm:$0xff] %v698_v3 }
 0x2bc PF: > { %s18_s27 = sadd.s32 1, %s934_s27  }
 0x2bd   : > { %p15_p4 = scmp.ge.s32.totalorder %s18_s27, 4  }
 0x2bf   :  { %17 = sbr.rel (!%p15_p4) target bundleno = 1 (0x1), region = 91 }

</bundles_post_ra>
